<compile_context>
chip_gen: v7x
topology: tpu7x:2x2x1
jax: 0.10.0
libtpu: 0.0.40
codegen_flags: <defaults>
</compile_context>

<pallas_src>
import functools

import jax
import jax.numpy as jnp
from jax import lax
from jax.experimental import pallas as pl
from jax.experimental.pallas import tpu as pltpu


def _conv_relu_pool_kernel(x_ref, w_ref, b_ref, o_ref, *,
                           TB, C_in, C_out, L, K, L_conv, L_pool, P):
    # x_ref: (TB, C_in, L)       input block, NCL (PyTorch layout)
    # w_ref: (K*C_in, C_out)     im2col weight matrix
    # b_ref: (1, C_out)          bias
    # o_ref: (TB, C_out, L_pool) output block, NCL
    xb = x_ref[...]
    w = w_ref[...]
    b = b_ref[...]

    # Build the im2col matrix (TB*L_conv, K*C_in) in VMEM.  Tap k of batch n is
    # padded-input rows [k : k+L_conv), constructed as [0-rows | x_n | 0-rows]
    # -> pure zero concatenation, no misaligned sublane slicing of x.
    rows = []
    for n in range(TB):                              # static unroll (TB small)
        x_lc = xb[n].T                               # (L, C_in), channels-last
        taps = []
        for k in range(K):                           # static unroll
            top, bot = K - 1 - k, k
            pieces = []
            if top:
                pieces.append(jnp.zeros((top, C_in), jnp.float32))
            pieces.append(x_lc)
            if bot:
                pieces.append(jnp.zeros((bot, C_in), jnp.float32))
            taps.append(pieces[0] if len(pieces) == 1
                        else jnp.concatenate(pieces, axis=0))    # (L_conv, C_in)
        rows.append(taps[0] if K == 1
                    else jnp.concatenate(taps, axis=1))          # (L_conv, K*C_in)
    im2col = rows[0] if TB == 1 else jnp.concatenate(rows, axis=0)

    # Single MXU matmul for the whole batch block.
    acc = jnp.dot(im2col, w, preferred_element_type=jnp.float32)  # (TB*L_conv, C_out)
    acc = jnp.maximum(acc + b, 0.0)                               # bias + ReLU

    # max_pool1d(kernel=P, stride=P, floor) and store directly in NCL layout.
    for n in range(TB):                              # static unroll
        a = acc[n * L_conv:n * L_conv + L_pool * P, :]            # (L_pool*P, C_out)
        pooled = jnp.max(a.reshape(L_pool, P, C_out), axis=1)     # (L_pool, C_out)
        o_ref[n] = pooled.T.astype(o_ref.dtype)                   # (C_out, L_pool)


def conv_layer_forward(x_ncl, weight, bias, pooling_size):
    """x_ncl: (N, C_in, L).  weight: (C_out, C_in, K).  bias: (C_out,)."""
    N, C_in, L = x_ncl.shape
    C_out, _, K = weight.shape
    P = int(pooling_size)
    L_conv = L + K - 1
    L_pool = L_conv // P

    # Batch block: largest divisor of N that is <= 8 (whole batch for tiny N).
    TB = next(t for t in range(min(N, 8), 0, -1) if N % t == 0)
    NB = N // TB

    # Only a tiny (K*C_in, C_out) weight rearrangement happens outside the
    # kernel; x is passed through untouched (no transpose / pad HBM copies).
    w2 = jnp.transpose(weight, (2, 1, 0)).reshape(K * C_in, C_out).astype(jnp.float32)
    b2 = bias.reshape(1, C_out).astype(jnp.float32)

    kernel = functools.partial(
        _conv_relu_pool_kernel, TB=TB, C_in=C_in, C_out=C_out, L=L, K=K,
        L_conv=L_conv, L_pool=L_pool, P=P)

    return pl.pallas_call(
        kernel,
        out_shape=jax.ShapeDtypeStruct((N, C_out, L_pool), jnp.float32),
        grid_spec=pltpu.PrefetchScalarGridSpec(
            num_scalar_prefetch=0,
            grid=(NB,),
            in_specs=[
                pl.BlockSpec((TB, C_in, L), lambda b: (b, 0, 0)),
                pl.BlockSpec((K * C_in, C_out), lambda b: (0, 0)),
                pl.BlockSpec((1, C_out), lambda b: (0, 0)),
            ],
            out_specs=pl.BlockSpec((TB, C_out, L_pool), lambda b: (b, 0, 0)),
        ),
        compiler_params=pltpu.CompilerParams(
            dimension_semantics=("parallel",)),
    )(x_ncl.astype(jnp.float32), w2, b2)


def _reference(x_ncl, weight, bias, pooling_size):
    """Pure-JAX reference mirroring F.relu(conv1d(...)) + max_pool1d."""
    K = weight.shape[-1]
    conv = lax.conv_general_dilated(
        x_ncl, weight, window_strides=(1,), padding=[(K - 1, K - 1)],
        dimension_numbers=("NCH", "OIH", "NCH"))
    conv = conv + bias[None, :, None]
    conv = jnp.maximum(conv, 0.0)
    N, C, Lc = conv.shape
    P = int(pooling_size)
    Lp = Lc // P
    return jnp.max(conv[:, :, :Lp * P].reshape(N, C, Lp, P), axis=-1)


if __name__ == "__main__":
    # Module config (synthetic, deterministic init — no checkpoint load).
    input_units, num_filters, filter_size = 4, 8, 3
    batch, length, pooling_size = 2, 16, 2

    key = jax.random.PRNGKey(0)
    kx, kw, kb = jax.random.split(key, 3)
    x = jax.random.normal(kx, (batch, input_units, length), dtype=jnp.float32)
    # PyTorch default Conv1d init is uniform(-1/sqrt(fan_in), 1/sqrt(fan_in)).
    bound = 1.0 / (input_units * filter_size) ** 0.5
    weight = jax.random.uniform(kw, (num_filters, input_units, filter_size),
                                minval=-bound, maxval=bound, dtype=jnp.float32)
    bias = jax.random.uniform(kb, (num_filters,), minval=-bound, maxval=bound,
                              dtype=jnp.float32)

    out = conv_layer_forward(x, weight, bias, pooling_size)
    out = jax.block_until_ready(out)

    ref = _reference(x, weight, bias, pooling_size)
    assert out.shape == ref.shape, (out.shape, ref.shape)
    assert jnp.allclose(out, ref, atol=1e-5, rtol=1e-5), "mismatch vs reference"
    print("KERNEL_OK")
</pallas_src>

<mosaic_0001>
module attributes {stable_mosaic.version = 11 : i64} {
  func.func @_conv_relu_pool_kernel(%arg0: i32, %arg1: memref<2x4x16xf32, #tpu.memory_space<vmem>>, %arg2: memref<12x8xf32, #tpu.memory_space<vmem>>, %arg3: memref<1x8xf32, #tpu.memory_space<vmem>>, %arg4: memref<2x8x9xf32, #tpu.memory_space<vmem>>) attributes {dimension_semantics = [#tpu.dimension_semantics<parallel>], iteration_bounds = array<i64: 1>, scalar_prefetch = 0 : i64, scratch_operands = 0 : i64, tpu.core_type = #tpu.core_type<tc>, window_params = [{transform_indices = @transform_0, window_bounds = array<i64: 2, 4, 16>}, {pipeline_mode = #tpu.pipeline_mode<synchronous>, transform_indices = @transform_1, window_bounds = array<i64: 12, 8>}, {pipeline_mode = #tpu.pipeline_mode<synchronous>, transform_indices = @transform_2, window_bounds = array<i64: 1, 8>}, {transform_indices = @transform_3, window_bounds = array<i64: 2, 8, 9>}]} {
    %c0 = arith.constant 0 : index
    %c0_0 = arith.constant 0 : index
    %c0_1 = arith.constant 0 : index
    %0 = vector.load %arg1[%c0, %c0_0, %c0_1] : memref<2x4x16xf32, #tpu.memory_space<vmem>>, vector<2x4x16xf32>
    %c0_2 = arith.constant 0 : index
    %c0_3 = arith.constant 0 : index
    %1 = vector.load %arg2[%c0_2, %c0_3] : memref<12x8xf32, #tpu.memory_space<vmem>>, vector<12x8xf32>
    %c0_4 = arith.constant 0 : index
    %c0_5 = arith.constant 0 : index
    %2 = vector.load %arg3[%c0_4, %c0_5] : memref<1x8xf32, #tpu.memory_space<vmem>>, vector<1x8xf32>
    %3 = vector.extract_strided_slice %0 {offsets = [0, 0, 0], sizes = [1, 4, 16], strides = [1, 1, 1]} : vector<2x4x16xf32> to vector<1x4x16xf32>
    %4 = vector.shape_cast %3 : vector<1x4x16xf32> to vector<4x16xf32>
    %5 = tpu.transpose %4, [1, 0] : vector<4x16xf32> -> vector<16x4xf32>
    %cst = arith.constant 0.000000e+00 : f32
    %6 = vector.broadcast %cst : f32 to vector<2x4xf32>
    %7 = tpu.concatenate %6, %5 in 0 : vector<2x4xf32>, vector<16x4xf32> -> vector<18x4xf32>
    %cst_6 = arith.constant 0.000000e+00 : f32
    %8 = vector.broadcast %cst_6 : f32 to vector<1x4xf32>
    %cst_7 = arith.constant 0.000000e+00 : f32
    %9 = vector.broadcast %cst_7 : f32 to vector<1x4xf32>
    %10 = tpu.concatenate %8, %5, %9 in 0 : vector<1x4xf32>, vector<16x4xf32>, vector<1x4xf32> -> vector<18x4xf32>
    %cst_8 = arith.constant 0.000000e+00 : f32
    %11 = vector.broadcast %cst_8 : f32 to vector<2x4xf32>
    %12 = tpu.concatenate %5, %11 in 0 : vector<16x4xf32>, vector<2x4xf32> -> vector<18x4xf32>
    %13 = tpu.concatenate %7, %10, %12 in 1 : vector<18x4xf32>, vector<18x4xf32>, vector<18x4xf32> -> vector<18x12xf32>
    %14 = vector.extract_strided_slice %0 {offsets = [1, 0, 0], sizes = [1, 4, 16], strides = [1, 1, 1]} : vector<2x4x16xf32> to vector<1x4x16xf32>
    %15 = vector.shape_cast %14 : vector<1x4x16xf32> to vector<4x16xf32>
    %16 = tpu.transpose %15, [1, 0] : vector<4x16xf32> -> vector<16x4xf32>
    %cst_9 = arith.constant 0.000000e+00 : f32
    %17 = vector.broadcast %cst_9 : f32 to vector<2x4xf32>
    %18 = tpu.concatenate %17, %16 in 0 : vector<2x4xf32>, vector<16x4xf32> -> vector<18x4xf32>
    %cst_10 = arith.constant 0.000000e+00 : f32
    %19 = vector.broadcast %cst_10 : f32 to vector<1x4xf32>
    %cst_11 = arith.constant 0.000000e+00 : f32
    %20 = vector.broadcast %cst_11 : f32 to vector<1x4xf32>
    %21 = tpu.concatenate %19, %16, %20 in 0 : vector<1x4xf32>, vector<16x4xf32>, vector<1x4xf32> -> vector<18x4xf32>
    %cst_12 = arith.constant 0.000000e+00 : f32
    %22 = vector.broadcast %cst_12 : f32 to vector<2x4xf32>
    %23 = tpu.concatenate %16, %22 in 0 : vector<16x4xf32>, vector<2x4xf32> -> vector<18x4xf32>
    %24 = tpu.concatenate %18, %21, %23 in 1 : vector<18x4xf32>, vector<18x4xf32>, vector<18x4xf32> -> vector<18x12xf32>
    %25 = tpu.concatenate %13, %24 in 0 : vector<18x12xf32>, vector<18x12xf32> -> vector<36x12xf32>
    %cst_13 = arith.constant dense<0.000000e+00> : vector<36x8xf32>
    %26 = tpu.matmul %25, %1, %cst_13 {dimension_numbers = #tpu.dot_dimension_numbers<[1], [0], [0], [1], [0, 0, 1, 1], [], []>} : vector<36x12xf32>, vector<12x8xf32>, vector<36x8xf32> -> vector<36x8xf32>
    %27 = vector.broadcast %2 : vector<1x8xf32> to vector<36x8xf32>
    %28 = arith.addf %26, %27 : vector<36x8xf32>
    %cst_14 = arith.constant 0.000000e+00 : f32
    %29 = vector.broadcast %cst_14 : f32 to vector<36x8xf32>
    %30 = arith.maximumf %28, %29 : vector<36x8xf32>
    %31 = vector.extract_strided_slice %30 {offsets = [0, 0], sizes = [18, 8], strides = [1, 1]} : vector<36x8xf32> to vector<18x8xf32>
    %32 = vector.shape_cast %31 : vector<18x8xf32> to vector<9x2x8xf32>
    %cst_15 = arith.constant dense<0xFF800000> : vector<9x8xf32>
    %33 = vector.multi_reduction <maximumf>, %32, %cst_15 [1] : vector<9x2x8xf32> to vector<9x8xf32>
    %34 = tpu.transpose %33, [1, 0] : vector<9x8xf32> -> vector<8x9xf32>
    %c0_16 = arith.constant 0 : index
    %c0_17 = arith.constant 0 : index
    %c0_18 = arith.constant 0 : index
    %35 = vector.load %arg4[%c0_16, %c0_17, %c0_18] : memref<2x8x9xf32, #tpu.memory_space<vmem>>, vector<1x8x9xf32>
    %36 = vector.shape_cast %35 : vector<1x8x9xf32> to vector<8x9xf32>
    %37 = vector.shape_cast %34 : vector<8x9xf32> to vector<1x8x9xf32>
    tpu.vector_store %arg4[%c0_16, %c0_17, %c0_18], %37 {strides = array<i32>} : memref<2x8x9xf32, #tpu.memory_space<vmem>>, vector<1x8x9xf32>,
    %38 = vector.extract_strided_slice %30 {offsets = [18, 0], sizes = [18, 8], strides = [1, 1]} : vector<36x8xf32> to vector<18x8xf32>
    %39 = vector.shape_cast %38 : vector<18x8xf32> to vector<9x2x8xf32>
    %cst_19 = arith.constant dense<0xFF800000> : vector<9x8xf32>
    %40 = vector.multi_reduction <maximumf>, %39, %cst_19 [1] : vector<9x2x8xf32> to vector<9x8xf32>
    %41 = tpu.transpose %40, [1, 0] : vector<9x8xf32> -> vector<8x9xf32>
    %c1 = arith.constant 1 : index
    %c0_20 = arith.constant 0 : index
    %c0_21 = arith.constant 0 : index
    %42 = vector.load %arg4[%c1, %c0_20, %c0_21] : memref<2x8x9xf32, #tpu.memory_space<vmem>>, vector<1x8x9xf32>
    %43 = vector.shape_cast %42 : vector<1x8x9xf32> to vector<8x9xf32>
    %44 = vector.shape_cast %41 : vector<8x9xf32> to vector<1x8x9xf32>
    tpu.vector_store %arg4[%c1, %c0_20, %c0_21], %44 {strides = array<i32>} : memref<2x8x9xf32, #tpu.memory_space<vmem>>, vector<1x8x9xf32>,
    return
  }
  func.func @transform_0(%arg0: i32) -> (i32, i32, i32) {
    %c0_i32 = arith.constant 0 : i32
    %c0_i32_0 = arith.constant 0 : i32
    %c0_i32_1 = arith.constant 0 : i32
    return %arg0, %c0_i32, %c0_i32_0 : i32, i32, i32
  }
  func.func @transform_1(%arg0: i32) -> (i32, i32) {
    %c0_i32 = arith.constant 0 : i32
    %c0_i32_0 = arith.constant 0 : i32
    %c0_i32_1 = arith.constant 0 : i32
    return %c0_i32, %c0_i32_0 : i32, i32
  }
  func.func @transform_2(%arg0: i32) -> (i32, i32) {
    %c0_i32 = arith.constant 0 : i32
    %c0_i32_0 = arith.constant 0 : i32
    %c0_i32_1 = arith.constant 0 : i32
    return %c0_i32, %c0_i32_0 : i32, i32
  }
  func.func @transform_3(%arg0: i32) -> (i32, i32, i32) {
    %c0_i32 = arith.constant 0 : i32
    %c0_i32_0 = arith.constant 0 : i32
    %c0_i32_1 = arith.constant 0 : i32
    return %arg0, %c0_i32, %c0_i32_0 : i32, i32, i32
  }
}

</mosaic_0001>

<bundles_post_ra>
// kernel: tpu_custom_call.1
= control target key start
LH: loop header
LB: loop body
LE: loop exit
PB: predicated region body
PF: predicated region fallthrough
CT: control target
= control target key end

     0   :  { %s891_s0 = inlined_call_operand.vmem [shape: f32[2,4,16], index: 0, kind: input, shape index: {}]   ;;  %s892_s1 = inlined_call_operand.vmem [shape: f32[12,8], index: 1, kind: input, shape index: {}]   ;;  %s893_s2 = inlined_call_operand.vmem [shape: f32[1,8], index: 2, kind: input, shape index: {}]   ;;  %s894_s3 = inlined_call_operand.hbm [shape: f32[2,8,9], index: 3, kind: output, shape index: {}]  }
   0x1   :  { %v15_v0 = vld [vmem:[%s891_s0] sm:$0xf] }
   0x2   :  { %8 = vsyncpa [#allocation3], 0  ;;  %20 = vxpose.xlu0.b32.start.end [1/1] (short) (narrow) %v15_v0, 16  ;;  %v16_v1 = vld [vmem:[%s891_s0 + $0x4] sm:$0xf]  ;;  %vm200_vm0 = vcmask 1043456   ;;  %v306_v60 = vlaneseq }
   0x3   :  { %v17_v2 = vld [vmem:[%s892_s1] sm:$0xff]  ;;  %v18_v3 = vld [vmem:[%s892_s1 + $0x8] sm:$0xf]  ;;  %v724_v4 = vmov 0.0|0.0   ;;  %vm725_vm1 = vmmov 1   ;;  %vm726_vm3 = vmmov 0  }
   0x4   :  { %685 = vmatprep.subr.bf16.mxu0 %v724_v4  ;;  %v686_v5 = vpack.c.bf16 %v18_v3, %v17_v2  ;;  %vm687_vm2 = vmpackc.low %vm200_vm0, %vm725_vm1  ;;  %689 = vmatprep.subr.bf16.mxu1 %v724_v4  ;;  %v727_v6 = vmov 0.0   ;;  %vm62_vm4 = vcmask 1040384   ;;  %s728_s0 = smov 8   ;;  %s729_s1 = smov 4   ;;  %vm54_vm5 = vcmask 1041408  }
   0x5   :  { %670 = vmatprep.mubr.msk.f32.mxu0 %vm726_vm3, %v727_v6  ;;  %679 = vmatprep.mubr.msk.f32.mxu1 %vm726_vm3, %v727_v6  ;;  %vm91_vm6 = vcmask 31744   ;;  %vm95_vm7 = vcmask 64512   ;;  %vm186_vm8 = vcmask 97280   ;;  %v730_v58 = vmov 1983009808  }
   0x6   :  { %688 = vmatpush3.bf16.msk.msra.mxu0 %vm687_vm2, %v686_v5  ;;  %690 = vmatpush3.bf16.msk.msra.mxu1 %vm687_vm2, %v686_v5  ;;  %v304_v59 = vunpack.c.l.s4 %v730_v58  ;;  %v307_v62 = vshrl.u32 %v306_v60, 7  ;;  %v814_v63 = vld [vmem:[%s893_s2] ss:$0 sm:$0xff]  ;;  %vm352_vm9 = vcmask 58368   ;;  %vm425_vm10 = vcmask 1041409   ;;  %s731_s2 = smov [#allocation2]  }
   0x7   :  { %99 = vxpose.xlu0.b32.start.end [1/1] (short) (narrow) %v16_v1, 16  ;;  %vm427_vm11 = vcmask 1042434   ;;  %vm429_vm12 = vcmask 1043459   ;;  %vm431_vm13 = vcmask 1044484   ;;  %vm433_vm14 = vcmask 1045509   ;;  %s641_s22 = sshll.u32 %s731_s2, 4  ;;  %s642_s22 = int_to_ptr.vmem [resolvable:$true] %s641_s22 }
   0x8   :  { %v305_v61 = vunpack.c.0.s8 %v304_v59  ;;  %vm435_vm15 = vcmask 1046534   ;;  %vm437_vm0 = vcmask 1047559   ;;  %vm473_vm1 = vcmask 72704   ;;  %s700_s23 = scalar_lea.vmem %s642_s22, 256  ;;  %p705_p1 = scmp.lt.s32.totalorder %s642_s22, %s642_s22 }
   0x9   :  { %p701_p0 = scmp.ne.s32.totalorder %s642_s22, %s700_s23  ;;  %p706_p2 = scmp.lt.s32.totalorder %s700_s23, %s700_s23 }
   0xa   :  { %v817_v2 = vsub.s32 %v305_v61, %v307_v62 }
   0xb   :  { %p707_p3 = por %p706_p2, %p705_p1 }
   0xd   :  { %p708_p4 = pnand %p707_p3, %p701_p0 }
  0x82   :  { %v36_v7 = vpop.trf.xlu0 }
  0x83   :  { %v63_v8 = vrot.slane %v36_v7, 7  ;;  %82 = vrot.lane.b32.xlu1 %v36_v7, %s728_s0  ;;  %v55_v11 = vrot.slane %v36_v7, 6 }
  0x85   :  { %v68_v9 = vsel %vm62_vm4, 0.0, %v63_v8  ;;  %v61_v25 = vsel %vm54_vm5, 0.0, %v55_v11 }
  0x86   :  { %v37_v10 = vpop.trf.xlu0 }
  0x87   :  { %v56_v12 = vrot.slane %v37_v10, 6  ;;  %72 = vrot.lane.b32.xlu1 %v68_v9, %s729_s1  ;;  %84 = vrot.lane.b32.xlu0 %v37_v10, %s728_s0  ;;  %v64_v17 = vrot.slane %v37_v10, 7 }
  0x89   :  { %v57_v13 = vsel %vm54_vm5, %v55_v11, %v56_v12  ;;  %v65_v18 = vsel %vm62_vm4, %v63_v8, %v64_v17  ;;  %v69_v21 = vsel %vm62_vm4, %v64_v17, 0.0 }
  0x8a   :  { %v115_v14 = vpop.trf.xlu0 }
  0x8b   :  { %v140_v15 = vrot.slane %v115_v14, 7  ;;  %v133_v31 = vrot.slane %v115_v14, 6 }
  0x8d   :  { %v145_v16 = vsel %vm62_vm4, 0.0, %v140_v15  ;;  %v139_v33 = vsel %vm54_vm5, 0.0, %v133_v31 }
  0x8e   :  { %149 = vrot.lane.b32.xlu1 %v145_v16, %s729_s1  ;;  %v116_v19 = vpop.trf.xlu0 }
  0x8f   :  { %v141_v20 = vrot.slane %v116_v19, 7  ;;  %v134_v44 = vrot.slane %v116_v19, 6 }
  0x91   :  { %v142_v22 = vsel %vm62_vm4, %v140_v15, %v141_v20  ;;  %v146_v23 = vsel %vm62_vm4, %v141_v20, 0.0  ;;  %v135_v47 = vsel %vm54_vm5, %v133_v31, %v134_v44 }
  0x92   :  { %158 = vrot.lane.b32.xlu1 %v115_v14, %s728_s0 }
  0x96   :  { %86 = vrot.lane.b32.xlu1 %v727_v6, %s728_s0 }
  0x9a   :  { %74 = vrot.lane.b32.xlu1 %v65_v18, %s729_s1 }
  0x9e   :  { %76 = vrot.lane.b32.xlu1 %v69_v21, %s729_s1 }
  0xa2   :  { %151 = vrot.lane.b32.xlu1 %v142_v22, %s729_s1 }
  0xa6   :  { %160 = vrot.lane.b32.xlu1 %v116_v19, %s728_s0 }
  0xaa   :  { %153 = vrot.lane.b32.xlu1 %v146_v23, %s729_s1 }
  0xf5   :  { %v83_v24 = vpop.permute.xlu1 %82 }
  0xf9   :  { %v73_v26 = vpop.permute.xlu1 %72  ;;  %v85_v35 = vpop.permute.xlu0 %84 }
  0xfa   :  { %v92_v27 = vsel %vm91_vm6, %v61_v25, %v73_v26 }
  0xfb   :  { %v96_v28 = vsel %vm95_vm7, %v92_v27, %v83_v24 }
  0xfc   :  { %671 = vmatmul.mubr.msk.f32.vlgmr.msra.gmra.mrb[0].mxu0 %vm186_vm8, %v96_v28 }
  0xfd   :  { %673 = vmatprep.mubr.msk.f32.mxu0 %vm726_vm3, %v727_v6 }
 0x100   :  { %v150_v29 = vpop.permute.xlu1 %149 }
 0x101   :  { %v164_v36 = vsel %vm91_vm6, %v139_v33, %v150_v29 }
 0x104   :  { %v159_v30 = vpop.permute.xlu1 %158 }
 0x105   :  { %v167_v38 = vsel %vm95_vm7, %v164_v36, %v159_v30 }
 0x106   :  { %v173_v41 = vrot.slane %v167_v38, 6 }
 0x108   :  { %v87_v32 = vpop.permute.xlu1 %86 }
 0x10c   :  { %v75_v34 = vpop.permute.xlu1 %74 }
 0x10d   :  { %v93_v37 = vsel %vm91_vm6, %v57_v13, %v75_v34 }
 0x10e   :  { %v97_v39 = vsel %vm95_vm7, %v93_v37, %v85_v35 }
 0x10f   :  { %674 = vmatmul.mubr.msk.f32.gmra.mrb[2].mxu0 %vm186_vm8, %v97_v39 }
 0x110   :  { %v77_v40 = vpop.permute.xlu1 %76  ;;  %676 = vmatprep.mubr.msk.f32.mxu0 %vm726_vm3, %v727_v6 }
 0x111   :  { %v94_v42 = vsel %vm91_vm6, %v56_v12, %v77_v40 }
 0x112   :  { %v98_v43 = vsel %vm95_vm7, %v94_v42, %v87_v32 }
 0x113   :  { %v179_v45 = vsel %vm54_vm5, %v98_v43, %v173_v41 }
 0x114   :  { %v152_v46 = vpop.permute.xlu1 %151  ;;  %677 = vmatmul.mubr.msk.f32.gmra.mrb[4].mxu0 %vm186_vm8, %v179_v45 }
 0x115   :  { %v165_v48 = vsel %vm91_vm6, %v135_v47, %v152_v46 }
 0x118   :  { %v161_v49 = vpop.permute.xlu1 %160 }
 0x119   :  { %v168_v50 = vsel %vm95_vm7, %v165_v48, %v161_v49 }
 0x11a   :  { %v174_v51 = vrot.slane %v168_v50, 6 }
 0x11c   :  { %v154_v52 = vpop.permute.xlu1 %153  ;;  %v175_v53 = vsel %vm54_vm5, %v173_v41, %v174_v51 }
 0x11d   :  { %v166_v54 = vsel %vm91_vm6, %v134_v44, %v154_v52  ;;  %680 = vmatmul.mubr.msk.f32.vlgmr.msra.gmra.mrb[0].mxu1 %vm186_vm8, %v175_v53 }
 0x11e   :  { %v169_v55 = vsel %vm95_vm7, %v166_v54, %v87_v32  ;;  %682 = vmatprep.mubr.msk.f32.mxu1 %vm726_vm3, %v727_v6 }
 0x11f   :  { %v176_v56 = vrot.slane %v169_v55, 6 }
 0x121   :  { %v177_v57 = vsel %vm54_vm5, %v174_v51, %v176_v56 }
 0x122   :  { %683 = vmatmul.mubr.msk.f32.gmra.mrb[2].mxu1 %vm186_vm8, %v177_v57 }
 0x1cf   :  { %v270_v0 = vpop.f32.mrb[0].mxu0 }
 0x1d0   :  { %v271_v1 = vadd.f32 %v814_v63, %v270_v0  ;;  %v672_v3 = vpop.f32.mrb[1].mxu0 }
 0x1d2   :  { %v294_v4 = vmax.f32 %v271_v1, 0.0 }
 0x1d4   :  { %v302_v5 = vcombine.high %v294_v4, %v294_v4  ;;  %v309_v6 = vrot.slane %v294_v4, %v817_v2 }
 0x1d6   :  { %v316_v7 = vrot.slane %v302_v5, %v817_v2  ;;  %v317_v8 = vcombine.high %v309_v6, %v309_v6  ;;  %v353_v9 = vsel %vm352_vm9, %v309_v6, -inf }
 0x1d7   :  { %v354_v10 = vrot.slane %v353_v9, 4 }
 0x1d8   :  { %v318_v11 = vcombine.high %v316_v7, %v316_v7  ;;  %v360_v12 = vsel %vm352_vm9, %v317_v8, -inf  ;;  %v367_v13 = vsel %vm352_vm9, %v316_v7, -inf }
 0x1d9   :  { %v355_v14 = vmax.f32 %v353_v9, %v354_v10  ;;  %v361_v15 = vrot.slane %v360_v12, 4  ;;  %v368_v16 = vrot.slane %v367_v13, 4 }
 0x1da   :  { %v374_v17 = vsel %vm352_vm9, %v318_v11, -inf }
 0x1db   :  { %v356_v18 = vrot.slane %v355_v14, 2  ;;  %v362_v19 = vmax.f32 %v360_v12, %v361_v15  ;;  %v369_v20 = vmax.f32 %v367_v13, %v368_v16  ;;  %v375_v21 = vrot.slane %v374_v17, 4 }
 0x1dd   :  { %v363_v22 = vrot.slane %v362_v19, 2  ;;  %v370_v23 = vrot.slane %v369_v20, 2  ;;  %v376_v24 = vmax.f32 %v374_v17, %v375_v21  ;;  %v357_v25 = vmax.f32 %v355_v14, %v356_v18 }
 0x1df   :  { %v364_v26 = vmax.f32 %v362_v19, %v363_v22  ;;  %v371_v27 = vmax.f32 %v369_v20, %v370_v23  ;;  %v377_v28 = vrot.slane %v376_v24, 2  ;;  %v358_v30 = vrot.slane %v357_v25, 1 }
 0x1e1   :  { %v365_v29 = vrot.slane %v364_v26, 1  ;;  %v378_v31 = vmax.f32 %v376_v24, %v377_v28  ;;  %v372_v33 = vrot.slane %v371_v27, 1  ;;  %v359_v38 = vmax.f32 %v357_v25, %v358_v30 }
 0x1e2   :  { %v275_v32 = vpop.f32.mrb[2].mxu0 }
 0x1e3   :  { %v276_v34 = vadd.f32 %v814_v63, %v275_v32  ;;  %v675_v35 = vpop.f32.mrb[3].mxu0  ;;  %v366_v36 = vmax.f32 %v364_v26, %v365_v29  ;;  %v379_v39 = vrot.slane %v378_v31, 1  ;;  %v373_v40 = vmax.f32 %v371_v27, %v372_v33 }
 0x1e5   :  { %v295_v37 = vmax.f32 %v276_v34, 0.0  ;;  %v426_v46 = vsel %vm425_vm10, %v366_v36, %v359_v38  ;;  %v380_v52 = vmax.f32 %v378_v31, %v379_v39 }
 0x1e6   :  { %v428_v56 = vsel %vm427_vm11, %v373_v40, %v426_v46 }
 0x1e7   :  { %v319_v41 = vcombine.high %v295_v37, %v295_v37  ;;  %v326_v42 = vrot.slane %v295_v37, %v817_v2  ;;  %v280_v43 = vpop.f32.mrb[4].mxu0  ;;  %v836_v3 = vsel %vm429_vm12, %v380_v52, %v428_v56 }
 0x1e8   :  { %v281_v44 = vadd.f32 %v814_v63, %v280_v43  ;;  %v678_v45 = vpop.f32.mrb[5].mxu0 }
 0x1e9   :  { %v333_v47 = vrot.slane %v319_v41, %v817_v2  ;;  %v334_v48 = vcombine.high %v326_v42, %v326_v42  ;;  %v381_v49 = vsel %vm352_vm9, %v326_v42, -inf }
 0x1ea   :  { %v382_v50 = vrot.slane %v381_v49, 4  ;;  %v296_v51 = vmax.f32 %v281_v44, 0.0 }
 0x1eb   :  { %v335_v53 = vcombine.high %v333_v47, %v333_v47  ;;  %v388_v54 = vsel %vm352_vm9, %v334_v48, -inf  ;;  %v395_v55 = vsel %vm352_vm9, %v333_v47, -inf }
 0x1ec   :  { %v383_v57 = vmax.f32 %v381_v49, %v382_v50  ;;  %v389_v58 = vrot.slane %v388_v54, 4  ;;  %v396_v59 = vrot.slane %v395_v55, 4  ;;  %v342_v60 = vrot.slane %v296_v51, %v817_v2 }
 0x1ed   :  { %v477_v61 = vcombine.high %v296_v51, %v296_v51  ;;  %v839_v4 = vsel %vm352_vm9, %v335_v53, -inf }
 0x1ee   :  { %v384_v62 = vrot.slane %v383_v57, 2  ;;  %v390_v0 = vmax.f32 %v388_v54, %v389_v58  ;;  %v397_v1 = vmax.f32 %v395_v55, %v396_v59  ;;  %v409_v5 = vsel %vm352_vm9, %v342_v60, -inf }
 0x1ef   :  { %v484_v6 = vrot.slane %v477_v61, %v817_v2  ;;  %v485_v7 = vcombine.high %v342_v60, %v342_v60  ;;  %v410_v11 = vrot.slane %v409_v5, 4  ;;  %v403_v20 = vrot.slane %v839_v4, 4 }
 0x1f0   :  { %v385_v8 = vmax.f32 %v383_v57, %v384_v62  ;;  %v391_v9 = vrot.slane %v390_v0, 2  ;;  %v398_v10 = vrot.slane %v397_v1, 2  ;;  %v285_v12 = vpop.f32.mrb[0].mxu1 }
 0x1f1   :  { %v486_v13 = vcombine.high %v484_v6, %v484_v6  ;;  %v521_v14 = vsel %vm352_vm9, %v485_v7, -inf  ;;  %v528_v15 = vsel %vm352_vm9, %v484_v6, -inf  ;;  %v286_v16 = vadd.f32 %v814_v63, %v285_v12  ;;  %v681_v17 = vpop.f32.mrb[1].mxu1 }
 0x1f2   :  { %v386_v18 = vrot.slane %v385_v8, 1  ;;  %v392_v19 = vmax.f32 %v390_v0, %v391_v9  ;;  %v522_v21 = vrot.slane %v521_v14, 4  ;;  %v529_v22 = vrot.slane %v528_v15, 4 }
 0x1f3   :  { %v535_v23 = vsel %vm352_vm9, %v486_v13, -inf  ;;  %v297_v24 = vmax.f32 %v286_v16, 0.0  ;;  %v399_v25 = vmax.f32 %v397_v1, %v398_v10  ;;  %v850_v27 = vmax.f32 %v409_v5, %v410_v11 }
 0x1f4   :  { %v848_v26 = vmax.f32 %v385_v8, %v386_v18  ;;  %v523_v28 = vmax.f32 %v521_v14, %v522_v21  ;;  %v536_v29 = vrot.slane %v535_v23, 4  ;;  %v530_v30 = vmax.f32 %v528_v15, %v529_v22 }
 0x1f5   :  { %v487_v31 = vcombine.high %v297_v24, %v297_v24  ;;  %v494_v32 = vrot.slane %v297_v24, %v817_v2  ;;  %v290_v33 = vpop.f32.mrb[2].mxu1  ;;  %v393_v34 = vrot.slane %v392_v19, 1  ;;  %v400_v39 = vrot.slane %v399_v25, 1 }
 0x1f6   :  { %v524_v35 = vrot.slane %v523_v28, 2  ;;  %v537_v36 = vmax.f32 %v535_v23, %v536_v29  ;;  %v291_v37 = vadd.f32 %v814_v63, %v290_v33  ;;  %v684_v38 = vpop.f32.mrb[3].mxu1  ;;  %v531_v40 = vrot.slane %v530_v30, 2 }
 0x1f7   :  { %v501_v41 = vrot.slane %v487_v31, %v817_v2  ;;  %v502_v42 = vcombine.high %v494_v32, %v494_v32  ;;  %v542_v43 = vsel %vm352_vm9, %v494_v32, -inf  ;;  %v394_v62 = vmax.f32 %v392_v19, %v393_v34 }
 0x1f8   :  { %v525_v44 = vmax.f32 %v523_v28, %v524_v35  ;;  %v538_v45 = vrot.slane %v537_v36, 2  ;;  %v543_v46 = vrot.slane %v542_v43, 4  ;;  %v298_v47 = vmax.f32 %v291_v37, 0.0 }
 0x1f9   :  { %v532_v48 = vmax.f32 %v530_v30, %v531_v40  ;;  %v503_v49 = vcombine.high %v501_v41, %v501_v41  ;;  %v549_v50 = vsel %vm352_vm9, %v502_v42, -inf  ;;  %v556_v63 = vsel %vm352_vm9, %v501_v41, -inf }
 0x1fa   :  { %v526_v51 = vrot.slane %v525_v44, 1  ;;  %v539_v52 = vmax.f32 %v537_v36, %v538_v45  ;;  %v544_v53 = vmax.f32 %v542_v43, %v543_v46  ;;  %v550_v54 = vrot.slane %v549_v50, 4 }
 0x1fb   :  { %v533_v55 = vrot.slane %v532_v48, 1  ;;  %v557_v56 = vrot.slane %v556_v63, 4  ;;  %v563_v57 = vsel %vm352_vm9, %v503_v49, -inf  ;;  %v510_v58 = vrot.slane %v298_v47, %v817_v2 }
 0x1fc   :  { %v527_v59 = vmax.f32 %v525_v44, %v526_v51  ;;  %v545_v60 = vrot.slane %v544_v53, 2  ;;  %v551_v61 = vmax.f32 %v549_v50, %v550_v54  ;;  %v540_v0 = vrot.slane %v539_v52, 1 }
 0x1fd   :  { %v558_v1 = vmax.f32 %v556_v63, %v557_v56  ;;  %v564_v5 = vrot.slane %v563_v57, 4  ;;  %v511_v6 = vcombine.high %v510_v58, %v510_v58  ;;  %v534_v7 = vmax.f32 %v532_v48, %v533_v55 }
 0x1fe   :  { %v546_v8 = vmax.f32 %v544_v53, %v545_v60  ;;  %v552_v9 = vrot.slane %v551_v61, 2  ;;  %v570_v10 = vsel %vm352_vm9, %v510_v58, -inf  ;;  %v401_v17 = vmax.f32 %v399_v25, %v400_v39 }
 0x1ff   :  { %v559_v11 = vrot.slane %v558_v1, 2  ;;  %v565_v12 = vmax.f32 %v563_v57, %v564_v5  ;;  %v571_v13 = vrot.slane %v570_v10, 4  ;;  %v577_v14 = vsel %vm352_vm9, %v511_v6, -inf }
 0x200   :  { %v547_v15 = vrot.slane %v546_v8, 1  ;;  %v553_v2 = vmax.f32 %v551_v61, %v552_v9  ;;  %v578_v16 = vrot.slane %v577_v14, 4  ;;  %v404_v22 = vmax.f32 %v839_v4, %v403_v20 }
 0x201   :  { %v560_v18 = vmax.f32 %v558_v1, %v559_v11  ;;  %v566_v19 = vrot.slane %v565_v12, 2  ;;  %v572_v21 = vmax.f32 %v570_v10, %v571_v13  ;;  %v541_v23 = vmax.f32 %v539_v52, %v540_v0 }
 0x202   :  { %v554_v24 = vrot.slane %v553_v2, 1  ;;  %v579_v28 = vmax.f32 %v577_v14, %v578_v16  ;;  %v432_v29 = vsel %vm431_vm13, %v848_v26, %v836_v3  ;;  %v405_v32 = vrot.slane %v404_v22, 2 }
 0x203   :  { %v561_v30 = vrot.slane %v560_v18, 1  ;;  %v573_v31 = vrot.slane %v572_v21, 2  ;;  %v434_v33 = vsel %vm433_vm14, %v394_v62, %v432_v29  ;;  %v548_v25 = vmax.f32 %v546_v8, %v547_v15 }
 0x204   :  { %v580_v34 = vrot.slane %v579_v28, 2  ;;  %v436_v35 = vsel %vm435_vm15, %v401_v17, %v434_v33  ;;  %v412_v36 = vrot.slane %v850_v27, 2  ;;  %v555_v37 = vmax.f32 %v553_v2, %v554_v24 }
 0x205   :  { %v574_v4 = vmax.f32 %v572_v21, %v573_v31  ;;  %v406_v20 = vmax.f32 %v404_v22, %v405_v32  ;;  %v567_v38 = vmax.f32 %v565_v12, %v566_v19  ;;  %v562_v40 = vmax.f32 %v560_v18, %v561_v30 }
 0x206   :  { %v413_v39 = vmax.f32 %v850_v27, %v412_v36  ;;  %v593_v3 = vsel %vm425_vm10, %v534_v7, %v527_v59  ;;  %v581_v26 = vmax.f32 %v579_v28, %v580_v34 }
 0x207   :  { %v407_v41 = vrot.slane %v406_v20, 1  ;;  %v568_v42 = vrot.slane %v567_v38, 1  ;;  %v575_v43 = vrot.slane %v574_v4, 1  ;;  %v594_v44 = vsel %vm427_vm11, %v541_v23, %v593_v3 }
 0x208   :  { %v595_v45 = vsel %vm429_vm12, %v548_v25, %v594_v44  ;;  %v414_v50 = vrot.slane %v413_v39, 1  ;;  %v582_v52 = vrot.slane %v581_v26, 1 }
 0x209   :  { %v408_v46 = vmax.f32 %v406_v20, %v407_v41  ;;  %v569_v47 = vmax.f32 %v567_v38, %v568_v42  ;;  %v576_v48 = vmax.f32 %v574_v4, %v575_v43  ;;  %v596_v49 = vsel %vm431_vm13, %v555_v37, %v595_v45 }
 0x20a   :  { %v597_v27 = vsel %vm433_vm14, %v562_v40, %v596_v49  ;;  %v415_v54 = vmax.f32 %v413_v39, %v414_v50  ;;  %v583_v55 = vmax.f32 %v581_v26, %v582_v52 }
 0x20b   :  { %v438_v63 = vsel %vm437_vm0, %v408_v46, %v436_v35  ;;  %v598_v51 = vsel %vm435_vm15, %v569_v47, %v597_v27 }
 0x20c   :  { %441 = vxpose.xlu1.b32.start [1/2] (short) (narrow) %v438_v63, 8  ;;  %v599_v53 = vsel %vm437_vm0, %v576_v48, %v598_v51 }
 0x20d   :  { %602 = vxpose.xlu0.b32.start [1/2] (short) (narrow) %v599_v53, 8 }
 0x210   :  { %442 = vxpose.xlu1.b32.end [2/2] (short) (narrow) %v415_v54, 8 }
 0x211   :  { %603 = vxpose.xlu0.b32.end [2/2] (short) (narrow) %v583_v55, 8 }
 0x28c   :  { %v457_v56 = vpop.trf.xlu1 }
 0x28d   :  { %v618_v57 = vpop.trf.xlu0  ;;  %474 = vst.msk [vmem:[#allocation2] sm:$0xff] %vm473_vm1, %v457_v56 }
 0x28e   :  { %635 = vst.msk [vmem:[#allocation2 + $0x8] sm:$0xff] %vm473_vm1, %v618_v57 }
 0x28f   :  { %711 = shalt.err (!%p708_p4)
}
 0x290   :  { %s712_s26 = scalar_lea.hbm %s894_s3, 256 }
 0x291   :  { %p713_p5 = scmp.ne.s32.totalorder %s894_s3, %s712_s26  ;;  %p716_p6 = scmp.lt.u32.totalorder %s712_s26, %s894_s3 }
 0x293   :  { %p718_p7 = pnand %p716_p6, %p713_p5 }
 0x295   :  { %721 = shalt.err (!%p718_p7)
}
 0x296   :  { %s732_s4 = smov 128  }
 0x297   :  { %647 = dma.vmem_to_hbm [thread:$0]  %s642_s22, 256, %s894_s3, [#allocation3], %s732_s4, %s732_s4, %s728_s0  }
 0x298   :  { %722 = dma.done.wait [#allocation3], 256  }
 0x299   :  { %723 = vsyncadd [#allocation3], 4294967040 }
 0x29a   :  { %651 = vsyncpa [#allocation3], 1 }

</bundles_post_ra>
